<compile_context>
chip_gen: v7x
topology: tpu7x:2x2x1
jax: 0.10.0
libtpu: 0.0.40
codegen_flags: <defaults>
</compile_context>

<pallas_src>
import numpy as np
import jax
import jax.numpy as jnp
from jax.experimental import pallas as pl
from jax.experimental.pallas import tpu as pltpu


def _round_up(x, m):
    return ((x + m - 1) // m) * m


def _chip_info():
    """Best-effort (vmem_capacity_bytes, num_tensorcores) query.

    Purely an optimization hint; any failure falls back to conservative
    defaults that are safe on v5e / v6e / v7x.
    """
    vmem_bytes = None
    num_tc = 1
    try:
        info = pltpu.get_tpu_info()
        vmem_bytes = getattr(info, "vmem_capacity_bytes", None)
        for attr in ("num_cores", "num_tensorcores", "tensorcore_count", "core_count"):
            v = getattr(info, attr, None)
            if isinstance(v, int) and v > 0:
                num_tc = v
                break
        else:
            # Heuristic: v7x has 64 MiB VMEM per TC and 2 TCs per chip;
            # v5e/v6e have 128 MiB VMEM and a single TC.
            if isinstance(vmem_bytes, int) and vmem_bytes <= 64 * 1024 * 1024:
                num_tc = 2
    except Exception:
        pass
    return vmem_bytes, num_tc


def make_basis(cep_order, fft_length):
    """Deterministic 'parameter' construction (mirrors the module __init__ ramp
    buffer, folded with the hfft Hermitian cosine weights). Always float32:
    the basis is ~tens of KB and fetched effectively once, so narrowing it
    would cost accuracy for zero bandwidth benefit."""
    L = fft_length
    half = L // 2
    M = cep_order
    assert 0 <= M and 2 <= L and M <= half
    K = half + 1

    ramp = np.arange(M + 1, dtype=np.float64) * 0.5
    if M == half:
        ramp[-1] *= 2.0
    # hfft Hermitian-fold weights for a length-(M+1) half signal extended to L
    w = np.full(M + 1, 2.0, dtype=np.float64)
    w[0] = 1.0
    if M == half:
        w[-1] = 1.0
    m = np.arange(M + 1, dtype=np.float64)[:, None]
    k = np.arange(K, dtype=np.float64)[None, :]
    A = (ramp * w)[:, None] * np.cos(2.0 * np.pi * m * k / L)   # (M+1, K)
    return jnp.asarray(A, dtype=jnp.float32)


def c2ndps_kernel(c_ref, a_ref, o_ref):
    # c_ref: (TB, M+1)  rows = flattened batch, last dim = cepstrum coeffs
    # a_ref: (M+1, K)   float32 cosine/ramp basis, K = L//2 + 1
    # o_ref: (TB, K)    NDPS rows at semantic width (no HBM lane padding)
    o_ref[...] = jnp.dot(
        c_ref[...].astype(jnp.float32),
        a_ref[...],
        preferred_element_type=jnp.float32,
    ).astype(o_ref.dtype)


def c2ndps(c, cep_order, fft_length, tile_b=2048, out_dtype=None):
    """c: (..., M+1)  ->  n: (..., L//2 + 1)

    out_dtype: optionally narrow the (dominant) output writes, e.g. bf16,
    when downstream precision allows; accumulation stays f32 on the MXU.
    """
    L = fft_length
    K = L // 2 + 1
    Mp1 = cep_order + 1
    assert c.shape[-1] == Mp1

    out_dtype = jnp.dtype(c.dtype if out_dtype is None else out_dtype)
    A = make_basis(cep_order, fft_length)          # float32 (M+1, K)

    # Flatten all leading (batch) dims into rows, row-major (metadata-only).
    batch_shape = c.shape[:-1]
    B = int(np.prod(batch_shape)) if batch_shape else 1
    c2 = c.reshape(B, Mp1)

    # dtype-aware minimum sublane tile (f32: 8, bf16: 16, int8/fp8: 32); the
    # row tile feeds both the input block and the output block.
    c_item = jnp.dtype(c.dtype).itemsize
    o_item = out_dtype.itemsize
    min_rows = max({4: 8, 2: 16, 1: 32}.get(c_item, 8),
                   {4: 8, 2: 16, 1: 32}.get(o_item, 8))

    # Generation-aware VMEM budget: v5e/v6e have 128 MiB physical VMEM per TC,
    # v7x only 64 MiB (leave headroom there for compiler scratch).
    vmem_capacity, num_tc = _chip_info()
    if isinstance(vmem_capacity, int) and vmem_capacity > 96 * 1024 * 1024:
        vmem_limit, vmem_budget = 64 * 1024 * 1024, 48 * 1024 * 1024   # v5e/v6e
    elif isinstance(vmem_capacity, int):
        vmem_limit, vmem_budget = 40 * 1024 * 1024, 32 * 1024 * 1024   # v7x
    else:
        vmem_limit, vmem_budget = 32 * 1024 * 1024, 24 * 1024 * 1024   # unknown

    # ---- row-tile selection -------------------------------------------------
    tile_b = min(int(tile_b), B)
    if tile_b < B:
        tile_b = max(min_rows, (tile_b // min_rows) * min_rows)
    # Only on dual-TensorCore chips (v7x): keep >= 2 grid steps when the batch
    # allows, so dimension_semantics=("parallel",) shards rows across cores.
    # On single-TC chips (v5e/v6e) splitting only adds per-step overhead.
    if num_tc >= 2 and B > min_rows:
        half_rows = _round_up(-(-B // 2), min_rows)
        tile_b = min(tile_b, half_rows)

    # VMEM guard: double-buffered c/A/out blocks + f32 matmul slab. Output and
    # basis tiles are lane-padded to a multiple of 128 in VMEM (layout only).
    k_lanes = _round_up(K, 128)

    def _vmem_bytes(tb):
        return (2 * (tb * Mp1 * c_item + Mp1 * k_lanes * 4 + tb * k_lanes * o_item)
                + tb * k_lanes * 4)

    while tile_b > min_rows and _vmem_bytes(tile_b) > vmem_budget:
        nt = max(min_rows, ((tile_b // 2) // min_rows) * min_rows)
        if nt == tile_b:
            break
        tile_b = nt

    grid = (pl.cdiv(B, tile_b),)

    cost = pl.CostEstimate(
        flops=2 * B * Mp1 * K,
        transcendentals=0,
        bytes_accessed=B * Mp1 * c_item + Mp1 * K * 4 + B * K * o_item,
    )

    out = pl.pallas_call(
        c2ndps_kernel,
        out_shape=jax.ShapeDtypeStruct((B, K), out_dtype),
        grid_spec=pltpu.PrefetchScalarGridSpec(
            num_scalar_prefetch=0,
            grid=grid,
            in_specs=[
                # NOTE: the last row-block may be partial (B % tile_b != 0).
                # Rows are independent, so the undefined OOB input rows only
                # feed output rows whose writes Pallas masks out. Do NOT add a
                # cross-row reduction, an o_ref read, or cross-step
                # accumulation here without restoring explicit row padding.
                pl.BlockSpec((tile_b, Mp1), lambda i: (i, 0)),
                pl.BlockSpec((Mp1, K), lambda i: (0, 0)),
            ],
            out_specs=pl.BlockSpec((tile_b, K), lambda i: (i, 0)),
        ),
        compiler_params=pltpu.CompilerParams(
            dimension_semantics=("parallel",),
            vmem_limit_bytes=vmem_limit,
        ),
        cost_estimate=cost,
    )(c2, A)

    # Leading-dim reshape only (last dim unchanged) -> metadata, no copy.
    return out.reshape(*batch_shape, K)


def c2ndps_ref(c, cep_order, fft_length):
    """Host-side float64 reference using np.fft.hfft (same semantics as
    torch.fft.hfft in the original module)."""
    c_np = np.asarray(jax.device_get(c)).astype(np.float64)
    half = fft_length // 2
    ramp = np.arange(cep_order + 1, dtype=np.float64) * 0.5
    if cep_order == half:
        ramp[-1] *= 2.0
    v = c_np * ramp
    return np.fft.hfft(v, n=fft_length)[..., : half + 1]


if __name__ == "__main__":
    root = jax.random.PRNGKey(0)
    k0, k1, k2 = jax.random.split(root, 3)

    # --- Small case (module example scale): M=4, L=16 -> K=9 ----------------
    cep_order, fft_length = 4, 16
    c = jax.random.normal(k0, (2, 8, cep_order + 1), dtype=jnp.float32)
    n = jax.block_until_ready(c2ndps(c, cep_order, fft_length))
    n_ref = c2ndps_ref(c, cep_order, fft_length)
    assert n.shape == (2, 8, fft_length // 2 + 1), n.shape
    err = float(np.max(np.abs(np.asarray(n, dtype=np.float64) - n_ref)))
    assert err < 1e-3, err

    # --- Multi-step grid with partial last block: M=24, L=512 -> K=257 ------
    # B = 4*50 = 200 rows with tile_b=64 -> 4 grid steps, last block partial,
    # non-128-multiple output width (257) stored directly (masked last group).
    cep_order, fft_length = 24, 512
    c_mid = jax.random.normal(k1, (4, 50, cep_order + 1), dtype=jnp.float32)
    n_mid = jax.block_until_ready(c2ndps(c_mid, cep_order, fft_length, tile_b=64))
    n_mid_ref = c2ndps_ref(c_mid, cep_order, fft_length)
    assert n_mid.shape == (4, 50, fft_length // 2 + 1), n_mid.shape
    err = float(np.max(np.abs(np.asarray(n_mid, dtype=np.float64) - n_mid_ref)))
    assert err < 5e-3, err

    # --- Edge case M == L/2 (ramp/weight fold) and tiny batch (B < 8) -------
    cep_order, fft_length = 8, 16
    c_edge = jax.random.normal(k2, (3, cep_order + 1), dtype=jnp.float32)
    n_edge = jax.block_until_ready(c2ndps(c_edge, cep_order, fft_length))
    n_edge_ref = c2ndps_ref(c_edge, cep_order, fft_length)
    assert n_edge.shape == (3, fft_length // 2 + 1), n_edge.shape
    err = float(np.max(np.abs(np.asarray(n_edge, dtype=np.float64) - n_edge_ref)))
    assert err < 1e-3, err

    print("KERNEL_OK")
</pallas_src>

<mosaic_0001>
module attributes {stable_mosaic.version = 11 : i64} {
  func.func @c2ndps_kernel(%arg0: i32, %arg1: memref<16x5xf32, #tpu.memory_space<vmem>>, %arg2: memref<5x9xf32, #tpu.memory_space<vmem>>, %arg3: memref<16x9xf32, #tpu.memory_space<vmem>>) attributes {dimension_semantics = [#tpu.dimension_semantics<parallel>], iteration_bounds = array<i64: 1>, scalar_prefetch = 0 : i64, scratch_operands = 0 : i64, tpu.core_type = #tpu.core_type<tc>, window_params = [{transform_indices = @transform_0, window_bounds = array<i64: 16, 5>}, {pipeline_mode = #tpu.pipeline_mode<synchronous>, transform_indices = @transform_1, window_bounds = array<i64: 5, 9>}, {transform_indices = @transform_2, window_bounds = array<i64: 16, 9>}]} {
    %c0 = arith.constant 0 : index
    %c0_0 = arith.constant 0 : index
    %0 = vector.load %arg1[%c0, %c0_0] : memref<16x5xf32, #tpu.memory_space<vmem>>, vector<16x5xf32>
    %c0_1 = arith.constant 0 : index
    %c0_2 = arith.constant 0 : index
    %1 = vector.load %arg2[%c0_1, %c0_2] : memref<5x9xf32, #tpu.memory_space<vmem>>, vector<5x9xf32>
    %cst = arith.constant dense<0.000000e+00> : vector<16x9xf32>
    %2 = tpu.matmul %0, %1, %cst {dimension_numbers = #tpu.dot_dimension_numbers<[1], [0], [0], [1], [0, 0, 1, 1], [], []>} : vector<16x5xf32>, vector<5x9xf32>, vector<16x9xf32> -> vector<16x9xf32>
    %c0_3 = arith.constant 0 : index
    %c0_4 = arith.constant 0 : index
    %3 = vector.load %arg3[%c0_3, %c0_4] : memref<16x9xf32, #tpu.memory_space<vmem>>, vector<16x9xf32>
    tpu.vector_store %arg3[%c0_3, %c0_4], %2 {strides = array<i32>} : memref<16x9xf32, #tpu.memory_space<vmem>>, vector<16x9xf32>,
    return
  }
  func.func @transform_0(%arg0: i32) -> (i32, i32) {
    %c0_i32 = arith.constant 0 : i32
    %c0_i32_0 = arith.constant 0 : i32
    return %arg0, %c0_i32 : i32, i32
  }
  func.func @transform_1(%arg0: i32) -> (i32, i32) {
    %c0_i32 = arith.constant 0 : i32
    %c0_i32_0 = arith.constant 0 : i32
    %c0_i32_1 = arith.constant 0 : i32
    return %c0_i32, %c0_i32_0 : i32, i32
  }
  func.func @transform_2(%arg0: i32) -> (i32, i32) {
    %c0_i32 = arith.constant 0 : i32
    %c0_i32_0 = arith.constant 0 : i32
    return %arg0, %c0_i32 : i32, i32
  }
}

</mosaic_0001>

<bundles_post_ra>
// kernel: tpu_custom_call.1
= control target key start
LH: loop header
LB: loop body
LE: loop exit
PB: predicated region body
PF: predicated region fallthrough
CT: control target
= control target key end

     0   :  { %vm22_vm0 = vcmask 1044480   ;;  %vm15_vm1 = vcmask 39936   ;;  %s197_s0 = inlined_call_operand.vmem [shape: f32[16,5], index: 0, kind: input, shape index: {}]   ;;  %s198_s1 = inlined_call_operand.vmem [shape: f32[5,9], index: 1, kind: input, shape index: {}]   ;;  %s199_s2 = inlined_call_operand.hbm [shape: f32[16,9], index: 2, kind: output, shape index: {}]  }
   0x1   :  { %v14_v0 = vld [vmem:[%s198_s1] sm:$0x1f]  ;;  %v13_v2 = vld [vmem:[%s197_s0 + $0x8] sm:$0xff] }
   0x2   :  { %v12_v1 = vld [vmem:[%s197_s0] sm:$0xff]  ;;  %126 = vmatprep.subr.msk.mxu0 %vm22_vm0, %v14_v0 }
   0x3   :  { %128 = vmatprep.mubr.msk.f32.mxu0 %vm15_vm1, %v12_v1 }
   0x4   :  { %7 = vsyncpa [#allocation3], 0  ;;  %127 = vmatpush3.msk.msra.mxu0 %vm22_vm0, %v14_v0  ;;  %s158_s15 = smov [#allocation2]   ;;  %vm101_vm2 = vcmask 72704  }
   0x5   :  { %129 = vmatmul.mubr.msk.f32.vlgmr.msra.gmra.mrb[0].mxu0 %vm15_vm1, %v13_v2  ;;  %s109_s16 = sshll.u32 %s158_s15, 4  ;;  %s110_s16 = int_to_ptr.vmem [resolvable:$true] %s109_s16 }
   0x6   :  { %s134_s1 = scalar_lea.vmem %s110_s16, 256  ;;  %p139_p1 = scmp.lt.s32.totalorder %s110_s16, %s110_s16 }
   0x7   :  { %p135_p0 = scmp.ne.s32.totalorder %s110_s16, %s134_s1  ;;  %p140_p2 = scmp.lt.s32.totalorder %s134_s1, %s134_s1 }
   0x9   :  { %p141_p3 = por %p140_p2, %p139_p1 }
   0xb   :  { %p142_p4 = pnand %p141_p3, %p135_p0 }
  0xd8   :  { %v130_v3 = vpop.f32.mrb[0].mxu0 }
  0xd9   :  { %103 = vst.msk [vmem:[#allocation2 + $0x8] sm:$0xff] %vm101_vm2, %v130_v3  ;;  %v92_v4 = vpop.f32.mrb[1].mxu0 }
  0xda   :  { %102 = vst.msk [vmem:[#allocation2] sm:$0xff] %vm101_vm2, %v92_v4 }
  0xdb   :  { %145 = shalt.err (!%p142_p4)
}
  0xdc   :  { %s146_s18 = scalar_lea.hbm %s199_s2, 256 }
  0xdd   :  { %p147_p5 = scmp.ne.s32.totalorder %s199_s2, %s146_s18  ;;  %p150_p6 = scmp.lt.u32.totalorder %s146_s18, %s199_s2 }
  0xdf   :  { %p152_p7 = pnand %p150_p6, %p147_p5 }
  0xe1   :  { %155 = shalt.err (!%p152_p7)
}
  0xe2   :  { %s159_s23 = smov 128   ;;  %s160_s24 = smov 8  }
  0xe3   :  { %115 = dma.vmem_to_hbm [thread:$0]  %s110_s16, 256, %s199_s2, [#allocation3], %s159_s23, %s159_s23, %s160_s24  }
  0xe4   :  { %156 = dma.done.wait [#allocation3], 256  }
  0xe5   :  { %157 = vsyncadd [#allocation3], 4294967040 }
  0xe6   :  { %119 = vsyncpa [#allocation3], 1 }

</bundles_post_ra>
